<compile_context>
chip_gen: v5e
topology: v5e:2x2
jax: 0.10.0
libtpu: 0.0.40
codegen_flags: <defaults>
</compile_context>

<pallas_src>
import jax
import jax.numpy as jnp
from jax.experimental import pallas as pl
from jax.experimental.pallas import tpu as pltpu

H1, H2 = 30, 6  # hidden widths fixed by the PyTorch module

_LANE = 128
_MAX_TN = 512 * 1024            # hard cap on the lane (batch) tile, in columns
_MIN_COLS_PER_STEP = 8192       # per-step DMA >= ~0.4-0.8 MB -> step overhead <5%
_VMEM_STREAM_BUDGET = 0.45      # fraction of physical VMEM for the in/out streams


def _round_up(x, m):
    return ((x + m - 1) // m) * m


def _cdiv(a, b):
    return -(-a // b)


def _vmem_capacity_bytes():
    """Physical VMEM per TensorCore; conservative fallback if the query fails."""
    try:
        cap = getattr(pltpu.get_tpu_info(), "vmem_capacity_bytes", None)
        if cap:
            return int(cap)
    except Exception:  # defensive: never let a hw query break compilation
        pass
    return 64 * 1024 * 1024     # v7x per-TC size; safe lower bound for v5e/v6e


def _choose_tn(n, bytes_per_col, requested=None):
    """Pick the lane (batch) tile: as large as the VMEM budget allows (multiple
    of 128), then split into >=2 balanced grid steps when that is essentially
    free so multi-TensorCore chips (v7x) can shard the grid."""
    budget = int(_vmem_capacity_bytes() * _VMEM_STREAM_BUDGET)
    tn = budget // bytes_per_col
    tn = min(tn, _MAX_TN)
    if requested is not None:
        tn = min(tn, int(requested))
    tn = max(_LANE, (tn // _LANE) * _LANE)

    n_cols = _round_up(n, _LANE)
    tn = min(tn, n_cols)

    steps = _cdiv(n_cols, tn)
    # Force >=2 steps only when each step still moves plenty of data: needed on
    # v7x (2 TCs share the grid via dimension_semantics="parallel"), and costs
    # only one extra ~0.35us step on single-TC v5e/v6e -- noise at this size.
    if steps < 2 and n_cols >= 2 * _MIN_COLS_PER_STEP:
        steps = 2
    # Rebalance so all grid steps are (nearly) the same width; never grows tn.
    tn = _round_up(_cdiv(n_cols, steps), _LANE)
    return tn


def weather_net_kernel(xt_ref, w1_ref, b1_ref, w2_ref, b2_ref, w3_ref, b3_ref,
                       ot_ref):
    # xt_ref: [D_in, tn]   (batch on the lane axis -> dense vregs)
    xt = xt_ref[...]

    # layer1: [30, D_in] @ [D_in, tn] -> [30, tn], f32 accumulate on the MXU.
    h1 = jnp.dot(w1_ref[...], xt, preferred_element_type=jnp.float32)
    h1 = jnp.maximum(h1 + b1_ref[...].astype(jnp.float32), 0.0)

    # layer2: [6, 30] @ [30, tn] -> [6, tn]
    h2 = jnp.dot(w2_ref[...], h1, preferred_element_type=jnp.float32)
    h2 = jnp.maximum(h2 + b2_ref[...].astype(jnp.float32), 0.0)

    # layer3: [D_out, 6] @ [6, tn] -> [D_out, tn]
    # NOTE: the PyTorch module really does apply ReLU after layer3, keep it.
    h3 = jnp.dot(w3_ref[...], h2, preferred_element_type=jnp.float32)
    h3 = jnp.maximum(h3 + b3_ref[...].astype(jnp.float32), 0.0)

    # Single lane-dense down-cast at the store.
    # NOTE(v7x): if bundle dumps show the f32 bias+ReLU epilogue saturating the
    # VALU slots at 3.2 TB/s HBM, cast h1/h2 to bf16 before the epilogue (bf16
    # VALU) or fold b1 into W1 via an ones-row; on v5e/v6e HBM still dominates.
    ot_ref[...] = h3.astype(ot_ref.dtype)


def weather_net_forward_fm(xt, params, *, tn=None):
    """Fast path: feature-major contract, no wrapper relayouts.

    xt:      [D_in, N] activations (f32 or bf16), batch on the last (lane) axis.
    params:  w1 [30, D_in], b1 [30, 1], w2 [6, 30], b2 [6, 1],
             w3 [D_out, 6], b3 [D_out, 1]   (PyTorch-native [out, in] layout).
    returns  [D_out, N] in xt.dtype.
    """
    w1, b1 = params["w1"], params["b1"]
    w2, b2 = params["w2"], params["b2"]
    w3, b3 = params["w3"], params["b3"]

    D_in, N = xt.shape
    D_out = w3.shape[0]
    out_dtype = xt.dtype

    in_item = jnp.dtype(xt.dtype).itemsize
    out_item = jnp.dtype(out_dtype).itemsize
    # Double-buffered per-column footprint of the two streamed arrays.
    bytes_per_col = 2 * (D_in * in_item + D_out * out_item)
    tn_eff = _choose_tn(N, bytes_per_col, requested=tn)
    grid = (_cdiv(N, tn_eff),)       # partial trailing block is masked on store

    weight_bytes = sum(int(a.size) * jnp.dtype(a.dtype).itemsize
                       for a in (w1, b1, w2, b2, w3, b3))
    # Explicit VMEM budget from the actual footprint (streams + weights) plus
    # headroom for compiler-internal scratch, capped below physical VMEM.
    vmem_limit = min(int(_vmem_capacity_bytes() * 0.9),
                     bytes_per_col * tn_eff + 4 * weight_bytes + (16 << 20))

    full = lambda arr: pl.BlockSpec(arr.shape, lambda i: (0, 0))

    flops = 2 * N * (D_in * H1 + H1 * H2 + H2 * D_out)
    bytes_accessed = (int(xt.size) * in_item + N * D_out * out_item
                      + weight_bytes)

    return pl.pallas_call(
        weather_net_kernel,
        out_shape=jax.ShapeDtypeStruct((D_out, N), out_dtype),
        grid_spec=pltpu.PrefetchScalarGridSpec(
            num_scalar_prefetch=0,
            grid=grid,
            in_specs=[
                pl.BlockSpec((D_in, tn_eff), lambda i: (0, i)),   # x^T tile
                full(w1), full(b1),
                full(w2), full(b2),
                full(w3), full(b3),
            ],
            out_specs=pl.BlockSpec((D_out, tn_eff), lambda i: (0, i)),
        ),
        compiler_params=pltpu.CompilerParams(
            dimension_semantics=("parallel",),
            vmem_limit_bytes=vmem_limit,
        ),
        cost_estimate=pl.CostEstimate(
            flops=flops, transcendentals=0, bytes_accessed=bytes_accessed),
    )(xt, w1, b1, w2, b2, w3, b3)


def weather_net_forward(x, params, *, tn=None):
    """PyTorch-contract wrapper: x [N, D_in] -> [N, D_out] (drop-in forward).

    The x.T / out.T relayouts roughly double the HBM traffic of this
    bandwidth-bound problem; callers that can keep activations feature-major
    should call weather_net_forward_fm directly.
    """
    return weather_net_forward_fm(x.T, params, tn=tn).T


def init_params(key, d_in, d_out, dtype=jnp.float32):
    """PyTorch nn.Linear-style init: uniform(-1/sqrt(fan_in), 1/sqrt(fan_in)).
    Weights stored [out, in], biases [out, 1]."""
    dims = [(d_in, H1), (H1, H2), (H2, d_out)]
    params = {}
    keys = jax.random.split(key, 2 * len(dims))
    for idx, (fi, fo) in enumerate(dims):
        bound = 1.0 / jnp.sqrt(jnp.float32(fi))
        w = jax.random.uniform(keys[2 * idx], (fo, fi), jnp.float32,
                               -bound, bound).astype(dtype)
        b = jax.random.uniform(keys[2 * idx + 1], (fo, 1), jnp.float32,
                               -bound, bound).astype(dtype)
        params[f"w{idx + 1}"] = w
        params[f"b{idx + 1}"] = b
    return params


def reference_forward(x, params):
    h = jnp.maximum(x @ params["w1"].T + params["b1"].T, 0.0)
    h = jnp.maximum(h @ params["w2"].T + params["b2"].T, 0.0)
    h = jnp.maximum(h @ params["w3"].T + params["b3"].T, 0.0)
    return h


if __name__ == "__main__":
    key = jax.random.PRNGKey(0)
    k_x, k_x2, k_p = jax.random.split(key, 3)

    D_in, D_out = 8, 4
    params = init_params(k_p, D_in, D_out)

    # 1) f32, batch a multiple of 128 (single full tile at these sizes).
    N = 512
    x = jax.random.normal(k_x, (N, D_in), jnp.float32)
    out = jax.block_until_ready(weather_net_forward(x, params))
    ref = reference_forward(x, params)
    assert out.shape == (N, D_out)
    assert jnp.allclose(out, ref, atol=1e-5, rtol=1e-5)

    # 2) ragged batch (partial trailing block, no jnp.pad anywhere).
    N2 = 77
    x2 = jax.random.normal(k_x2, (N2, D_in), jnp.float32)
    out2 = jax.block_until_ready(weather_net_forward(x2, params))
    ref2 = reference_forward(x2, params)
    assert out2.shape == (N2, D_out)
    assert jnp.allclose(out2, ref2, atol=1e-5, rtol=1e-5)

    # 3) multi-step grid + feature-major fast path (tn override keeps it small).
    out3 = jax.block_until_ready(weather_net_forward_fm(x.T, params, tn=128))
    assert out3.shape == (D_out, N)
    assert jnp.allclose(out3.T, ref, atol=1e-5, rtol=1e-5)

    # 4) bf16 activations in / bf16 out (half the HBM bytes), f32 accumulate.
    xb = x.astype(jnp.bfloat16)
    outb = jax.block_until_ready(weather_net_forward(xb, params))
    refb = reference_forward(xb.astype(jnp.float32), params)
    assert outb.dtype == jnp.bfloat16
    assert jnp.allclose(outb.astype(jnp.float32), refb, atol=5e-2, rtol=5e-2)

    print("KERNEL_OK")
</pallas_src>

<mosaic_0001>
module attributes {stable_mosaic.version = 11 : i64} {
  func.func @weather_net_kernel(%arg0: i32, %arg1: memref<8x512xf32, #tpu.memory_space<vmem>>, %arg2: memref<30x8xf32, #tpu.memory_space<vmem>>, %arg3: memref<30x1xf32, #tpu.memory_space<vmem>>, %arg4: memref<6x30xf32, #tpu.memory_space<vmem>>, %arg5: memref<6x1xf32, #tpu.memory_space<vmem>>, %arg6: memref<4x6xf32, #tpu.memory_space<vmem>>, %arg7: memref<4x1xf32, #tpu.memory_space<vmem>>, %arg8: memref<4x512xf32, #tpu.memory_space<vmem>>) attributes {dimension_semantics = [#tpu.dimension_semantics<parallel>], iteration_bounds = array<i64: 1>, scalar_prefetch = 0 : i64, scratch_operands = 0 : i64, tpu.core_type = #tpu.core_type<tc>, window_params = [{transform_indices = @transform_0, window_bounds = array<i64: 8, 512>}, {pipeline_mode = #tpu.pipeline_mode<synchronous>, transform_indices = @transform_1, window_bounds = array<i64: 30, 8>}, {pipeline_mode = #tpu.pipeline_mode<synchronous>, transform_indices = @transform_2, window_bounds = array<i64: 30, 1>}, {pipeline_mode = #tpu.pipeline_mode<synchronous>, transform_indices = @transform_3, window_bounds = array<i64: 6, 30>}, {pipeline_mode = #tpu.pipeline_mode<synchronous>, transform_indices = @transform_4, window_bounds = array<i64: 6, 1>}, {pipeline_mode = #tpu.pipeline_mode<synchronous>, transform_indices = @transform_5, window_bounds = array<i64: 4, 6>}, {pipeline_mode = #tpu.pipeline_mode<synchronous>, transform_indices = @transform_6, window_bounds = array<i64: 4, 1>}, {transform_indices = @transform_7, window_bounds = array<i64: 4, 512>}]} {
    %c0 = arith.constant 0 : index
    %c0_0 = arith.constant 0 : index
    %0 = vector.load %arg1[%c0, %c0_0] : memref<8x512xf32, #tpu.memory_space<vmem>>, vector<8x512xf32>
    %c0_1 = arith.constant 0 : index
    %c0_2 = arith.constant 0 : index
    %1 = vector.load %arg2[%c0_1, %c0_2] : memref<30x8xf32, #tpu.memory_space<vmem>>, vector<30x8xf32>
    %cst = arith.constant dense<0.000000e+00> : vector<30x512xf32>
    %2 = tpu.matmul %1, %0, %cst {dimension_numbers = #tpu.dot_dimension_numbers<[1], [0], [0], [1], [0, 0, 1, 1], [], []>} : vector<30x8xf32>, vector<8x512xf32>, vector<30x512xf32> -> vector<30x512xf32>
    %c0_3 = arith.constant 0 : index
    %c0_4 = arith.constant 0 : index
    %3 = vector.load %arg3[%c0_3, %c0_4] : memref<30x1xf32, #tpu.memory_space<vmem>>, vector<30x1xf32>
    %4 = vector.broadcast %3 : vector<30x1xf32> to vector<30x512xf32>
    %5 = arith.addf %2, %4 : vector<30x512xf32>
    %cst_5 = arith.constant 0.000000e+00 : f32
    %6 = vector.broadcast %cst_5 : f32 to vector<30x512xf32>
    %7 = arith.maximumf %5, %6 : vector<30x512xf32>
    %c0_6 = arith.constant 0 : index
    %c0_7 = arith.constant 0 : index
    %8 = vector.load %arg4[%c0_6, %c0_7] : memref<6x30xf32, #tpu.memory_space<vmem>>, vector<6x30xf32>
    %cst_8 = arith.constant dense<0.000000e+00> : vector<6x512xf32>
    %9 = tpu.matmul %8, %7, %cst_8 {dimension_numbers = #tpu.dot_dimension_numbers<[1], [0], [0], [1], [0, 0, 1, 1], [], []>} : vector<6x30xf32>, vector<30x512xf32>, vector<6x512xf32> -> vector<6x512xf32>
    %c0_9 = arith.constant 0 : index
    %c0_10 = arith.constant 0 : index
    %10 = vector.load %arg5[%c0_9, %c0_10] : memref<6x1xf32, #tpu.memory_space<vmem>>, vector<6x1xf32>
    %11 = vector.broadcast %10 : vector<6x1xf32> to vector<6x512xf32>
    %12 = arith.addf %9, %11 : vector<6x512xf32>
    %cst_11 = arith.constant 0.000000e+00 : f32
    %13 = vector.broadcast %cst_11 : f32 to vector<6x512xf32>
    %14 = arith.maximumf %12, %13 : vector<6x512xf32>
    %c0_12 = arith.constant 0 : index
    %c0_13 = arith.constant 0 : index
    %15 = vector.load %arg6[%c0_12, %c0_13] : memref<4x6xf32, #tpu.memory_space<vmem>>, vector<4x6xf32>
    %cst_14 = arith.constant dense<0.000000e+00> : vector<4x512xf32>
    %16 = tpu.matmul %15, %14, %cst_14 {dimension_numbers = #tpu.dot_dimension_numbers<[1], [0], [0], [1], [0, 0, 1, 1], [], []>} : vector<4x6xf32>, vector<6x512xf32>, vector<4x512xf32> -> vector<4x512xf32>
    %c0_15 = arith.constant 0 : index
    %c0_16 = arith.constant 0 : index
    %17 = vector.load %arg7[%c0_15, %c0_16] : memref<4x1xf32, #tpu.memory_space<vmem>>, vector<4x1xf32>
    %18 = vector.broadcast %17 : vector<4x1xf32> to vector<4x512xf32>
    %19 = arith.addf %16, %18 : vector<4x512xf32>
    %cst_17 = arith.constant 0.000000e+00 : f32
    %20 = vector.broadcast %cst_17 : f32 to vector<4x512xf32>
    %21 = arith.maximumf %19, %20 : vector<4x512xf32>
    %c0_18 = arith.constant 0 : index
    %c0_19 = arith.constant 0 : index
    %22 = vector.load %arg8[%c0_18, %c0_19] : memref<4x512xf32, #tpu.memory_space<vmem>>, vector<4x512xf32>
    tpu.vector_store %arg8[%c0_18, %c0_19], %21 {strides = array<i32>} : memref<4x512xf32, #tpu.memory_space<vmem>>, vector<4x512xf32>,
    return
  }
  func.func @transform_0(%arg0: i32) -> (i32, i32) {
    %c0_i32 = arith.constant 0 : i32
    %c0_i32_0 = arith.constant 0 : i32
    return %c0_i32, %arg0 : i32, i32
  }
  func.func @transform_1(%arg0: i32) -> (i32, i32) {
    %c0_i32 = arith.constant 0 : i32
    %c0_i32_0 = arith.constant 0 : i32
    %c0_i32_1 = arith.constant 0 : i32
    return %c0_i32, %c0_i32_0 : i32, i32
  }
  func.func @transform_2(%arg0: i32) -> (i32, i32) {
    %c0_i32 = arith.constant 0 : i32
    %c0_i32_0 = arith.constant 0 : i32
    %c0_i32_1 = arith.constant 0 : i32
    return %c0_i32, %c0_i32_0 : i32, i32
  }
  func.func @transform_3(%arg0: i32) -> (i32, i32) {
    %c0_i32 = arith.constant 0 : i32
    %c0_i32_0 = arith.constant 0 : i32
    %c0_i32_1 = arith.constant 0 : i32
    return %c0_i32, %c0_i32_0 : i32, i32
  }
  func.func @transform_4(%arg0: i32) -> (i32, i32) {
    %c0_i32 = arith.constant 0 : i32
    %c0_i32_0 = arith.constant 0 : i32
    %c0_i32_1 = arith.constant 0 : i32
    return %c0_i32, %c0_i32_0 : i32, i32
  }
  func.func @transform_5(%arg0: i32) -> (i32, i32) {
    %c0_i32 = arith.constant 0 : i32
    %c0_i32_0 = arith.constant 0 : i32
    %c0_i32_1 = arith.constant 0 : i32
    return %c0_i32, %c0_i32_0 : i32, i32
  }
  func.func @transform_6(%arg0: i32) -> (i32, i32) {
    %c0_i32 = arith.constant 0 : i32
    %c0_i32_0 = arith.constant 0 : i32
    %c0_i32_1 = arith.constant 0 : i32
    return %c0_i32, %c0_i32_0 : i32, i32
  }
  func.func @transform_7(%arg0: i32) -> (i32, i32) {
    %c0_i32 = arith.constant 0 : i32
    %c0_i32_0 = arith.constant 0 : i32
    return %c0_i32, %arg0 : i32, i32
  }
}

</mosaic_0001>

<bundles_post_ra>
// kernel: tpu_custom_call.1
= control target key start
LH: loop header
LB: loop body
LE: loop exit
PB: predicated region body
PF: predicated region fallthrough
CT: control target
= control target key end

     0   :  { %vm59_vm0 = vcmask 64512   ;;  %s634_s0 = inlined_call_operand.vmem [shape: f32[8,512], index: 0, kind: input, shape index: {}]   ;;  %s635_s1 = inlined_call_operand.vmem [shape: f32[30,8], index: 1, kind: input, shape index: {}]   ;;  %s636_s2 = inlined_call_operand.vmem [shape: f32[30,1], index: 2, kind: input, shape index: {}]   ;;  %s637_s3 = inlined_call_operand.vmem [shape: f32[6,30], index: 3, kind: input, shape index: {}]   ;;  %s638_s4 = inlined_call_operand.vmem [shape: f32[6,1], index: 4, kind: input, shape index: {}]   ;;  %s639_s5 = inlined_call_operand.vmem [shape: f32[4,6], index: 5, kind: input, shape index: {}]   ;;  %s640_s6 = inlined_call_operand.vmem [shape: f32[4,1], index: 6, kind: input, shape index: {}]   ;;  %s641_s7 = inlined_call_operand.hbm [shape: f32[4,512], index: 7, kind: output, shape index: {}]  }
   0x1   :  { %v27_v0 = vld [vmem:[%s634_s0] sm:$0xff]  ;;  %v28_v1 = vld [vmem:[%s634_s0 + $0x8] sm:$0xff]  ;;  %v29_v2 = vld [vmem:[%s634_s0 + $0x10] sm:$0xff] }
   0x2   :  { %87 = vmatpush.msra.mxu0 %v27_v0  ;;  %116 = vmatpush.msra.mxu1 %v28_v1  ;;  %v30_v3 = vld [vmem:[%s634_s0 + $0x18] sm:$0xff]  ;;  %v31_v4 = vld [vmem:[%s635_s1] sm:$0xff]  ;;  %v36_v5 = vld [vmem:[%s636_s2 + $0x8] sm:$0xff] }
   0x3   :  { %145 = vmatpush.msra.mxu2 %v29_v2  ;;  %174 = vmatpush.msra.mxu3 %v30_v3  ;;  %v38_v6 = vld [vmem:[%s636_s2 + $0x18] sm:$0x3f] }
   0x4   :  { %448 = vmatmul.msk.f32.vlgmr.msra.gmra.mxu0 %vm59_vm0, %v31_v4  ;;  %452 = vmatmul.msk.f32.vlgmr.msra.gmra.mxu1 %vm59_vm0, %v31_v4 }
   0x5   :  { %456 = vmatmul.msk.f32.vlgmr.msra.gmra.mxu2 %vm59_vm0, %v31_v4  ;;  %460 = vmatmul.msk.f32.vlgmr.msra.gmra.mxu3 %vm59_vm0, %v31_v4 }
   0x6   :  { %12 = vsyncpa [#allocation3], 0  ;;  %v511_v7 = vmov 0   ;;  %v32_v8 = vld [vmem:[%s635_s1 + $0x8] sm:$0xff]  ;;  %v35_v9 = vld [vmem:[%s636_s2] sm:$0xff]  ;;  %vm215_vm1 = vcmask 1045504  }
   0x7   :  { %483 = vset.pattern.permute.xlu1 %v511_v7  ;;  %482 = vset.pattern.permute.xlu0 %v511_v7  ;;  %v37_v10 = vld [vmem:[%s636_s2 + $0x10] sm:$0xff]  ;;  %v34_v12 = vld [vmem:[%s635_s1 + $0x18] sm:$0x3f]  ;;  %v205_v19 = vld [vmem:[%s638_s4] sm:$0x3f]  ;;  %vm211_vm2 = vcmask 244736  }
   0x8   :  { %46 = vperm.xlu1 %483, %v36_v5   ;;  %56 = vperm.xlu0 %482, %v38_v6   ;;  %v33_v11 = vld [vmem:[%s635_s1 + $0x10] sm:$0xff]  ;;  %v313_v26 = vld [vmem:[%s640_s6] sm:$0xf]  ;;  %vm319_vm3 = vcmask 48128   ;;  %vm425_vm4 = vcmask 1043456   ;;  %s439_s30 = sshll.u32 %s641_s7, 4  ;;  %s440_s30 = int_to_ptr.hbm [resolvable:$true] %s439_s30 }
   0x9   :  { %484 = vset.pattern.permute.xlu2 %v511_v7  ;;  %v204_v59 = vld [vmem:[%s637_s3] sm:$0x3f] }
   0xa   :  { %208 = vperm.xlu2 %484, %v205_v19  }
   0xc   :  { %449 = vmatmul.msk.f32.gmra.mxu0 %vm59_vm0, %v32_v8  ;;  %453 = vmatmul.msk.f32.gmra.mxu1 %vm59_vm0, %v32_v8 }
   0xd   :  { %457 = vmatmul.msk.f32.gmra.mxu2 %vm59_vm0, %v32_v8  ;;  %461 = vmatmul.msk.f32.gmra.mxu3 %vm59_vm0, %v32_v8 }
  0x10   :  { %41 = vperm.xlu1 %483, %v35_v9   ;;  %51 = vperm.xlu0 %482, %v37_v10  }
  0x12   :  { %316 = vperm.xlu2 %484, %v313_v26  }
  0x14   :  { %450 = vmatmul.msk.f32.gmra.mxu0 %vm59_vm0, %v33_v11  ;;  %454 = vmatmul.msk.f32.gmra.mxu1 %vm59_vm0, %v33_v11 }
  0x15   :  { %458 = vmatmul.msk.f32.gmra.mxu2 %vm59_vm0, %v33_v11  ;;  %462 = vmatmul.msk.f32.gmra.mxu3 %vm59_vm0, %v33_v11  ;;  %v312_v11 = vld [vmem:[%s639_s5] sm:$0xf]  ;;  %s512_s5 = smov [#allocation2]  }
  0x16   :  { %s437_s27 = sshll.u32 %s512_s5, 4  ;;  %s438_s27 = int_to_ptr.vmem [resolvable:$true] %s437_s27 }
  0x1c   :  { %451 = vmatmul.msk.f32.gmra.mxu0 %vm59_vm0, %v34_v12  ;;  %455 = vmatmul.msk.f32.gmra.mxu1 %vm59_vm0, %v34_v12 }
  0x1d   :  { %459 = vmatmul.msk.f32.gmra.mxu2 %vm59_vm0, %v34_v12  ;;  %463 = vmatmul.msk.f32.gmra.mxu3 %vm59_vm0, %v34_v12 }
  0x64   :  { %v209_v4 = vpop.permute.xlu2 %208 }
  0x7a   :  { %v57_v20 = vpop.permute.xlu0 %56  ;;  %v47_v25 = vpop.permute.xlu1 %46 }
  0x81   :  { %v89_v13 = vpop.f32.mrf.mxu0  ;;  %v118_v14 = vpop.f32.mrf.mxu1 }
  0x82   :  { %v52_v27 = vpop.permute.xlu0 %51  ;;  %v42_v37 = vpop.permute.xlu1 %41 }
  0x83   :  { %v90_v41 = vadd.f32 %v89_v13, %v42_v37  ;;  %v119_v45 = vadd.f32 %v118_v14, %v42_v37 }
  0x85   :  { %v188_v53 = vmax.f32 %v90_v41, 0.0  ;;  %v189_v54 = vmax.f32 %v119_v45, 0.0 }
  0x88   :  { %v147_v15 = vpop.f32.mrf.mxu2  ;;  %v176_v16 = vpop.f32.mrf.mxu3 }
  0x89   :  { %v92_v17 = vpop.f32.mrf.mxu0  ;;  %v121_v18 = vpop.f32.mrf.mxu1  ;;  %v148_v60 = vadd.f32 %v147_v15, %v42_v37  ;;  %v177_v61 = vadd.f32 %v176_v16, %v42_v37 }
  0x8a   :  { %v93_v30 = vadd.f32 %v92_v17, %v47_v25  ;;  %v122_v38 = vadd.f32 %v121_v18, %v47_v25  ;;  %v317_v18 = vpop.permute.xlu2 %316 }
  0x8b   :  { %v190_v2 = vmax.f32 %v148_v60, 0.0  ;;  %v191_v3 = vmax.f32 %v177_v61, 0.0 }
  0x8c   :  { %v192_v42 = vmax.f32 %v93_v30, 0.0  ;;  %v193_v46 = vmax.f32 %v122_v38, 0.0 }
  0x90   :  { %v150_v21 = vpop.f32.mrf.mxu2  ;;  %v179_v22 = vpop.f32.mrf.mxu3 }
  0x91   :  { %v95_v23 = vpop.f32.mrf.mxu0  ;;  %v124_v24 = vpop.f32.mrf.mxu1  ;;  %v151_v55 = vadd.f32 %v150_v21, %v47_v25  ;;  %v180_v56 = vadd.f32 %v179_v22, %v47_v25 }
  0x92   :  { %v96_v35 = vadd.f32 %v95_v23, %v52_v27  ;;  %v125_v36 = vadd.f32 %v124_v24, %v52_v27 }
  0x93   :  { %v194_v0 = vmax.f32 %v151_v55, 0.0  ;;  %v195_v1 = vmax.f32 %v180_v56, 0.0 }
  0x94   :  { %v196_v43 = vmax.f32 %v96_v35, 0.0  ;;  %v197_v44 = vmax.f32 %v125_v36, 0.0 }
  0x98   :  { %v153_v28 = vpop.f32.mrf.mxu2  ;;  %v182_v29 = vpop.f32.mrf.mxu3 }
  0x99   :  { %v98_v31 = vpop.f32.mrf.mxu0  ;;  %v127_v32 = vpop.f32.mrf.mxu1  ;;  %v154_v49 = vadd.f32 %v153_v28, %v52_v27  ;;  %v183_v50 = vadd.f32 %v182_v29, %v52_v27 }
  0x9a   :  { %v99_v33 = vadd.f32 %v98_v31, %v57_v20  ;;  %v128_v34 = vadd.f32 %v127_v32, %v57_v20 }
  0x9b   :  { %v198_v62 = vmax.f32 %v154_v49, 0.0  ;;  %v199_v63 = vmax.f32 %v183_v50, 0.0 }
  0x9c   :  { %v200_v39 = vmax.f32 %v99_v33, 0.0  ;;  %v201_v40 = vmax.f32 %v128_v34, 0.0 }
  0x9e   :  { %464 = vmatpush.msk.msrb.mxu0 %vm215_vm1, %v200_v39  ;;  %466 = vmatpush.msk.msrb.mxu1 %vm215_vm1, %v201_v40 }
  0xa0   :  { %v156_v47 = vpop.f32.mrf.mxu2  ;;  %v185_v48 = vpop.f32.mrf.mxu3  ;;  %241 = vmatpush.msrb.mxu0 %v196_v43  ;;  %261 = vmatpush.msrb.mxu1 %v197_v44 }
  0xa1   :  { %v157_v51 = vadd.f32 %v156_v47, %v57_v20  ;;  %v186_v52 = vadd.f32 %v185_v48, %v57_v20 }
  0xa2   :  { %242 = vmatpush.msrb.mxu0 %v192_v42  ;;  %262 = vmatpush.msrb.mxu1 %v193_v46 }
  0xa3   :  { %v202_v57 = vmax.f32 %v157_v51, 0.0  ;;  %v203_v58 = vmax.f32 %v186_v52, 0.0 }
  0xa4   :  { %243 = vmatpush.msrb.mxu0 %v188_v53  ;;  %263 = vmatpush.msrb.mxu1 %v189_v54 }
  0xa5   :  { %468 = vmatpush.msk.msrb.mxu2 %vm215_vm1, %v202_v57  ;;  %470 = vmatpush.msk.msrb.mxu3 %vm215_vm1, %v203_v58 }
  0xa6   :  { %465 = vmatmul.msk.f32.vlgmr.msrb.gmra.mxu0 %vm211_vm2, %v204_v59  ;;  %467 = vmatmul.msk.f32.vlgmr.msrb.gmra.mxu1 %vm211_vm2, %v204_v59 }
  0xa7   :  { %281 = vmatpush.msrb.mxu2 %v198_v62  ;;  %301 = vmatpush.msrb.mxu3 %v199_v63 }
  0xa9   :  { %282 = vmatpush.msrb.mxu2 %v194_v0  ;;  %302 = vmatpush.msrb.mxu3 %v195_v1 }
  0xab   :  { %283 = vmatpush.msrb.mxu2 %v190_v2  ;;  %303 = vmatpush.msrb.mxu3 %v191_v3 }
  0xac   :  { %469 = vmatmul.msk.f32.vlgmr.msrb.gmra.mxu2 %vm211_vm2, %v204_v59  ;;  %471 = vmatmul.msk.f32.vlgmr.msrb.gmra.mxu3 %vm211_vm2, %v204_v59 }
 0x123   :  { %v245_v5 = vpop.f32.mrf.mxu0  ;;  %v265_v6 = vpop.f32.mrf.mxu1 }
 0x124   :  { %v246_v7 = vadd.f32 %v245_v5, %v209_v4  ;;  %v266_v8 = vadd.f32 %v265_v6, %v209_v4 }
 0x126   :  { %v308_v9 = vmax.f32 %v246_v7, 0.0  ;;  %v309_v10 = vmax.f32 %v266_v8, 0.0 }
 0x128   :  { %472 = vmatpush.msk.msra.mxu0 %vm215_vm1, %v308_v9  ;;  %474 = vmatpush.msk.msra.mxu1 %vm215_vm1, %v309_v10 }
 0x129   :  { %473 = vmatmul.msk.f32.vlgmr.msra.gmra.mxu0 %vm319_vm3, %v312_v11  ;;  %475 = vmatmul.msk.f32.vlgmr.msra.gmra.mxu1 %vm319_vm3, %v312_v11 }
 0x12f   :  { %v285_v12 = vpop.f32.mrf.mxu2  ;;  %v305_v13 = vpop.f32.mrf.mxu3 }
 0x130   :  { %v286_v14 = vadd.f32 %v285_v12, %v209_v4  ;;  %v306_v15 = vadd.f32 %v305_v13, %v209_v4 }
 0x132   :  { %v310_v16 = vmax.f32 %v286_v14, 0.0  ;;  %v311_v17 = vmax.f32 %v306_v15, 0.0 }
 0x134   :  { %476 = vmatpush.msk.msra.mxu2 %vm215_vm1, %v310_v16  ;;  %478 = vmatpush.msk.msra.mxu3 %vm215_vm1, %v311_v17 }
 0x135   :  { %477 = vmatmul.msk.f32.vlgmr.msra.gmra.mxu2 %vm319_vm3, %v312_v11  ;;  %479 = vmatmul.msk.f32.vlgmr.msra.gmra.mxu3 %vm319_vm3, %v312_v11 }
 0x1a6   :  { %v352_v19 = vpop.f32.mrf.mxu0  ;;  %v372_v20 = vpop.f32.mrf.mxu1 }
 0x1a7   :  { %v353_v21 = vadd.f32 %v352_v19, %v317_v18  ;;  %v373_v22 = vadd.f32 %v372_v20, %v317_v18 }
 0x1a9   :  { %v416_v23 = vmax.f32 %v373_v22, 0.0  ;;  %v415_v24 = vmax.f32 %v353_v21, 0.0 }
 0x1ab   :  { %v423_v25 = vrot.slane %v416_v23, 4 }
 0x1ad   :  { %v426_v26 = vsel %vm425_vm4, %v415_v24, %v423_v25 }
 0x1ae   :  { %430 = vst [vmem:[#allocation2] sm:$0xff] %v426_v26 }
 0x1b8   :  { %v392_v27 = vpop.f32.mrf.mxu2  ;;  %v412_v28 = vpop.f32.mrf.mxu3 }
 0x1b9   :  { %v393_v29 = vadd.f32 %v392_v27, %v317_v18  ;;  %v413_v30 = vadd.f32 %v412_v28, %v317_v18 }
 0x1bb   :  { %v418_v31 = vmax.f32 %v413_v30, 0.0  ;;  %v417_v32 = vmax.f32 %v393_v29, 0.0 }
 0x1bd   :  { %v424_v33 = vrot.slane %v418_v31, 4 }
 0x1bf   :  { %v427_v34 = vsel %vm425_vm4, %v417_v32, %v424_v33 }
 0x1c0   :  { %431 = vst [vmem:[#allocation2 + $0x8] sm:$0xff] %v427_v34 }
 0x1c1   :  { %442 = dma.vmem_to_hbm [thread:$0]  %s438_s27, 256, %s440_s30, [#allocation3]  }
 0x1c2   :  { %509 = dma.done.wait [#allocation3], 256  }
 0x1c3   :  { %510 = vsyncadd [#allocation3], 4294967040 }
 0x1c4   :  { %447 = vsyncpa [#allocation3], 1 }

</bundles_post_ra>
